<compile_context>
chip_gen: v7x
topology: tpu7x:2x2x1
jax: 0.10.0
libtpu: 0.0.40
codegen_flags: <defaults>
</compile_context>

<pallas_src>
import jax
import jax.numpy as jnp
from jax.experimental import pallas as pl
from jax.experimental.pallas import tpu as pltpu


# ----------------------------------------------------------------------------
# Pallas kernel: one mode-block of the block-complex spectral mixing matmul.
# ----------------------------------------------------------------------------
def _spectral_mix_kernel(x_ref, w_ref, o_ref):
    """x_ref: (TM, B, 2*Cin) bf16, w_ref: (TM, 2*Cin, 2*Cout) bf16,
    o_ref: (TM, B, 2*Cout) f32.

    Per mode m:  [xr, xi] @ [[wr, wi], [-wi, wr]] = [re, im]  on the MXU,
    accumulated in f32."""
    o_ref[...] = jnp.einsum(
        "mbi,mio->mbo",
        x_ref[...],
        w_ref[...],
        preferred_element_type=jnp.float32,
    ).astype(o_ref.dtype)


def _choose_mode_block(M, B, two_cin, two_cout, vmem_budget_bytes=8 * 1024 * 1024):
    """Pick TM (modes per grid step).

    Budget the double-buffered working set (bf16 x/w blocks + f32 out block)
    against a conservative VMEM budget that fits the default scoped limits on
    v5e/v6e and v7x's 64 MiB per-TC VMEM.  Prefer >= 2 grid steps so the
    parallel mode axis can be split across v7x's two TensorCores, but never
    fall back to per-mode steps (that is the overhead we are eliminating).
    """
    per_mode = 2 * (B * two_cin * 2 + two_cin * two_cout * 2 + B * two_cout * 4)
    tm_cap = max(1, vmem_budget_bytes // max(per_mode, 1))
    divisors = [d for d in range(1, M + 1) if M % d == 0 and d <= tm_cap]
    tm = max(divisors) if divisors else 1
    if tm == M and M > 1:
        sub = [d for d in divisors if d <= M // 2 and d >= 2]
        if sub:
            tm = max(sub)
    return tm


def _compl_mul1d_pallas(x_packed, w_packed):
    """x_packed: (M, B, 2*Cin) bf16, w_packed: (M, 2*Cin, 2*Cout) bf16
    -> (M, B, 2*Cout) f32 where [..., :Cout] = re, [..., Cout:] = im."""
    M, B, two_cin = x_packed.shape
    two_cout = w_packed.shape[2]
    tm = _choose_mode_block(M, B, two_cin, two_cout)

    return pl.pallas_call(
        _spectral_mix_kernel,
        out_shape=jax.ShapeDtypeStruct((M, B, two_cout), jnp.float32),
        grid_spec=pltpu.PrefetchScalarGridSpec(
            num_scalar_prefetch=0,
            grid=(M // tm,),
            in_specs=[
                pl.BlockSpec((tm, B, two_cin), lambda m: (m, 0, 0)),
                pl.BlockSpec((tm, two_cin, two_cout), lambda m: (m, 0, 0)),
            ],
            out_specs=pl.BlockSpec((tm, B, two_cout), lambda m: (m, 0, 0)),
        ),
        compiler_params=pltpu.CompilerParams(
            dimension_semantics=("parallel",),
            vmem_limit_bytes=32 * 1024 * 1024,
        ),
    )(x_packed, w_packed)


# ----------------------------------------------------------------------------
# Parameter-time weight packing (done once, outside the per-call forward).
# ----------------------------------------------------------------------------
def pack_spectral_weights(w_re, w_im, compute_dtype=jnp.bfloat16):
    """(Cin, Cout, M) re/im -> block-complex (M, 2*Cin, 2*Cout) in compute_dtype.

    W_m = [[wr_m,  wi_m],
           [-wi_m, wr_m]]   so that   [xr, xi] @ W_m = [re, im].
    """
    wr = jnp.transpose(w_re, (2, 0, 1))  # (M, Cin, Cout)
    wi = jnp.transpose(w_im, (2, 0, 1))
    top = jnp.concatenate([wr, wi], axis=2)        # (M, Cin, 2*Cout)
    bot = jnp.concatenate([-wi, wr], axis=2)       # (M, Cin, 2*Cout)
    w_packed = jnp.concatenate([top, bot], axis=1)  # (M, 2*Cin, 2*Cout)
    return w_packed.astype(compute_dtype)


# ----------------------------------------------------------------------------
# Forward pass (mirrors SpectralConv1d.forward).
# ----------------------------------------------------------------------------
def spectral_conv1d(x, w_packed):
    """x: (B, Cin, N) f32 (PyTorch NCW); w_packed: (M, 2*Cin, 2*Cout) from
    pack_spectral_weights.  Returns (B, Cout, N) f32."""
    B, Cin, N = x.shape
    M, two_cin, two_cout = w_packed.shape
    Cout = two_cout // 2
    assert two_cin == 2 * Cin
    assert M <= N // 2 + 1, "modes1 must not exceed N//2 + 1"

    # --- FFT (glue, plain JAX) ---
    x_ft = jnp.fft.rfft(x, axis=-1)                 # (B, Cin, N//2+1) c64
    xm = x_ft[:, :, :M]
    xr = jnp.real(xm)
    xi = jnp.imag(xm)

    # mode-major, block-complex packing of the activations: (M, B, 2*Cin)
    x_packed = jnp.concatenate(
        [jnp.transpose(xr, (2, 0, 1)), jnp.transpose(xi, (2, 0, 1))], axis=-1
    ).astype(w_packed.dtype)

    # --- hot path: fused complex mode mixing on the MXU ---
    o = _compl_mul1d_pallas(x_packed, w_packed)     # (M, B, 2*Cout) f32

    out_re = jnp.transpose(o[:, :, :Cout], (1, 2, 0))   # (B, Cout, M)
    out_im = jnp.transpose(o[:, :, Cout:], (1, 2, 0))

    # --- assemble truncated spectrum and inverse FFT (glue, plain JAX) ---
    out_ft = jnp.zeros((B, Cout, N // 2 + 1), dtype=jnp.complex64)
    out_ft = out_ft.at[:, :, :M].set(out_re + 1j * out_im)
    return jnp.fft.irfft(out_ft, n=N, axis=-1).astype(jnp.float32)


# ----------------------------------------------------------------------------
# References.
# ----------------------------------------------------------------------------
def _reference(x, w_re, w_im):
    """Exact f32 reference mirroring the PyTorch forward."""
    B, Cin, N = x.shape
    Cout, modes1 = w_re.shape[1], w_re.shape[2]
    w = (w_re + 1j * w_im).astype(jnp.complex64)
    x_ft = jnp.fft.rfft(x, axis=-1)
    mixed = jnp.einsum("bix,iox->box", x_ft[:, :, :modes1], w)
    out_ft = jnp.zeros((B, Cout, N // 2 + 1), dtype=jnp.complex64)
    out_ft = out_ft.at[:, :, :modes1].set(mixed)
    return jnp.fft.irfft(out_ft, n=N, axis=-1)


def _reference_bf16_inputs(x, w_re, w_im):
    """Reference that mirrors the kernel numerics: bf16 operands, f32 accumulate."""
    B, Cin, N = x.shape
    Cout, modes1 = w_re.shape[1], w_re.shape[2]
    x_ft = jnp.fft.rfft(x, axis=-1)
    xr = jnp.real(x_ft[:, :, :modes1]).astype(jnp.bfloat16).astype(jnp.float32)
    xi = jnp.imag(x_ft[:, :, :modes1]).astype(jnp.bfloat16).astype(jnp.float32)
    wr = w_re.astype(jnp.bfloat16).astype(jnp.float32)
    wi = w_im.astype(jnp.bfloat16).astype(jnp.float32)
    re = jnp.einsum("bix,iox->box", xr, wr) - jnp.einsum("bix,iox->box", xi, wi)
    im = jnp.einsum("bix,iox->box", xr, wi) + jnp.einsum("bix,iox->box", xi, wr)
    out_ft = jnp.zeros((B, Cout, N // 2 + 1), dtype=jnp.complex64)
    out_ft = out_ft.at[:, :, :modes1].set(re + 1j * im)
    return jnp.fft.irfft(out_ft, n=N, axis=-1)


if __name__ == "__main__":
    batch, in_channels, out_channels, N, modes1 = 2, 4, 4, 16, 8

    key = jax.random.PRNGKey(0)
    kx, kwr, kwi = jax.random.split(key, 3)

    x = jax.random.normal(kx, (batch, in_channels, N), dtype=jnp.float32)

    # weights1 = scale * torch.rand(Cin, Cout, modes1, dtype=cfloat)
    scale = 1.0 / (in_channels * out_channels)
    w_re = scale * jax.random.uniform(
        kwr, (in_channels, out_channels, modes1), dtype=jnp.float32)
    w_im = scale * jax.random.uniform(
        kwi, (in_channels, out_channels, modes1), dtype=jnp.float32)

    # One-time weight packing (parameter-init time, not per forward).
    w_packed = pack_spectral_weights(w_re, w_im)

    fwd = jax.jit(spectral_conv1d)
    out = jax.block_until_ready(fwd(x, w_packed))
    assert out.shape == (batch, out_channels, N)

    # Tight check against a reference with identical numerics
    # (bf16 operands, f32 accumulation in the mode-mixing matmul).
    ref_bf16 = _reference_bf16_inputs(x, w_re, w_im)
    assert jnp.allclose(out, ref_bf16, atol=1e-4, rtol=1e-4)

    # Looser sanity check against the exact f32 PyTorch-mirroring reference
    # (the only difference is bf16 rounding of the matmul operands).
    ref_f32 = _reference(x, w_re, w_im)
    assert jnp.allclose(out, ref_f32, atol=5e-2, rtol=5e-2)

    print("KERNEL_OK")
</pallas_src>

<mosaic_0001>
module attributes {stable_mosaic.version = 11 : i64} {
  func.func @_spectral_mix_kernel(%arg0: i32, %arg1: memref<4x2x8xbf16, #tpu.memory_space<vmem>>, %arg2: memref<4x8x8xbf16, #tpu.memory_space<vmem>>, %arg3: memref<4x2x8xf32, #tpu.memory_space<vmem>>) attributes {dimension_semantics = [#tpu.dimension_semantics<parallel>], iteration_bounds = array<i64: 2>, scalar_prefetch = 0 : i64, scratch_operands = 0 : i64, tpu.core_type = #tpu.core_type<tc>, window_params = [{transform_indices = @transform_0, window_bounds = array<i64: 4, 2, 8>}, {transform_indices = @transform_1, window_bounds = array<i64: 4, 8, 8>}, {transform_indices = @transform_2, window_bounds = array<i64: 4, 2, 8>}]} {
    %c0 = arith.constant 0 : index
    %c0_0 = arith.constant 0 : index
    %c0_1 = arith.constant 0 : index
    %0 = vector.load %arg1[%c0, %c0_0, %c0_1] : memref<4x2x8xbf16, #tpu.memory_space<vmem>>, vector<4x2x8xbf16>
    %c0_2 = arith.constant 0 : index
    %c0_3 = arith.constant 0 : index
    %c0_4 = arith.constant 0 : index
    %1 = vector.load %arg2[%c0_2, %c0_3, %c0_4] : memref<4x8x8xbf16, #tpu.memory_space<vmem>>, vector<4x8x8xbf16>
    "tpu.trace_start"() <{level = 10 : i32, message = "mbi,mio->mbo"}> : () -> ()
    %cst = arith.constant dense<0.000000e+00> : vector<4x2x8xf32>
    %2 = tpu.matmul %0, %1, %cst {dimension_numbers = #tpu.dot_dimension_numbers<[2], [1], [1], [2], [0, 0, 0, 1, 1, 2], [0], [0]>} : vector<4x2x8xbf16>, vector<4x8x8xbf16>, vector<4x2x8xf32> -> vector<4x2x8xf32>
    "tpu.trace_stop"() : () -> ()
    %c0_5 = arith.constant 0 : index
    %c0_6 = arith.constant 0 : index
    %c0_7 = arith.constant 0 : index
    %3 = vector.load %arg3[%c0_5, %c0_6, %c0_7] : memref<4x2x8xf32, #tpu.memory_space<vmem>>, vector<4x2x8xf32>
    tpu.vector_store %arg3[%c0_5, %c0_6, %c0_7], %2 {strides = array<i32>} : memref<4x2x8xf32, #tpu.memory_space<vmem>>, vector<4x2x8xf32>,
    return
  }
  func.func @transform_0(%arg0: i32) -> (i32, i32, i32) {
    %c0_i32 = arith.constant 0 : i32
    %c0_i32_0 = arith.constant 0 : i32
    %c0_i32_1 = arith.constant 0 : i32
    return %arg0, %c0_i32, %c0_i32_0 : i32, i32, i32
  }
  func.func @transform_1(%arg0: i32) -> (i32, i32, i32) {
    %c0_i32 = arith.constant 0 : i32
    %c0_i32_0 = arith.constant 0 : i32
    %c0_i32_1 = arith.constant 0 : i32
    return %arg0, %c0_i32, %c0_i32_0 : i32, i32, i32
  }
  func.func @transform_2(%arg0: i32) -> (i32, i32, i32) {
    %c0_i32 = arith.constant 0 : i32
    %c0_i32_0 = arith.constant 0 : i32
    %c0_i32_1 = arith.constant 0 : i32
    return %arg0, %c0_i32, %c0_i32_0 : i32, i32, i32
  }
}

</mosaic_0001>

<bundles_post_ra>
// kernel: reverse.1
= control target key start
LH: loop header
LB: loop body
LE: loop exit
PB: predicated region body
PF: predicated region fallthrough
CT: control target
= control target key end

     0   :  { %s92_s0 = inlined_call_operand.vmem [shape: f32[2,4,7], index: 0, kind: input, shape index: {}]   ;;  %s93_s1 = inlined_call_operand.vmem [shape: f32[2,4,7], index: 1, kind: output, shape index: {}]  }
   0x1   :  { %v28_v0 = vld [vmem:[%s92_s0 + $0xc] sm:$0x3]  ;;  %v29_v1 = vld [vmem:[%s92_s0 + $0xa] sm:$0x3]  ;;  %v31_v2 = vld [vmem:[%s92_s0 + $0x8] sm:$0x3] }
   0x2   :  { %4 = vst [vmem:[%s93_s1] sm:$0x3] %v28_v0  ;;  %30 = vst [vmem:[%s93_s1 + $0x2] sm:$0x3] %v29_v1  ;;  %v33_v3 = vld [vmem:[%s92_s0 + $0x6] sm:$0x3] }
   0x3   :  { %32 = vst [vmem:[%s93_s1 + $0x4] sm:$0x3] %v31_v2  ;;  %v35_v4 = vld [vmem:[%s92_s0 + $0x4] sm:$0x3]  ;;  %v37_v5 = vld [vmem:[%s92_s0 + $0x2] sm:$0x3] }
   0x4   :  { %34 = vst [vmem:[%s93_s1 + $0x6] sm:$0x3] %v33_v3  ;;  %36 = vst [vmem:[%s93_s1 + $0x8] sm:$0x3] %v35_v4  ;;  %v25_v6 = vld [vmem:[%s92_s0] sm:$0x3] }
   0x5   :  { %38 = vst [vmem:[%s93_s1 + $0xa] sm:$0x3] %v37_v5  ;;  %39 = vst [vmem:[%s93_s1 + $0xc] sm:$0x3] %v25_v6 }

// kernel: spectral_conv1d.1
= control target key start
LH: loop header
LB: loop body
LE: loop exit
PB: predicated region body
PF: predicated region fallthrough
CT: control target
= control target key end

     0   :  { %s514_s9 = smov 0   ;;  %s551_s0 = inlined_call_operand.vmem [shape: bf16[8,2,8], index: 0, kind: input, shape index: {}]   ;;  %s552_s1 = inlined_call_operand.vmem [shape: bf16[8,8,8], index: 1, kind: input, shape index: {}]   ;;  %s553_s2 = inlined_call_operand.vmem [shape: f32[8,2,8], index: 2, kind: output, shape index: {}]  }
   0x1 LB: > { %s431_s10 = sadd.s32 4294967295, %s495_s9   ;;  %p435_p0 = scmp.ge.s32.totalorder %s495_s9, 1  ;;  %s495_s9 = sphi %s514_s9, %s12_s9  }
   0x2   : > { %p123_p1 = scmp.lt.s32.totalorder %s495_s9, 3 }
   0x4   : > { %p124_p2 = pnand %p435_p0, %p123_p1 }
   0x5   : > { %s436_s11 = sshll.u32 (!%p124_p2), %s431_s10, 2  ;;  %v497_v0 = vmov (!%p124_p2), 0.0   ;;  %vm498_vm0 = vmmov (!%p124_p2), 0   ;;  %vm179_vm1 = vcmask (!%p124_p2), 1043456   ;;  %vm175_vm2 = vcmask (!%p124_p2), 64512  }
   0x6   : > { %127 = sbr.rel (%p124_p2) target bundleno = 244 (0xf4), region = 28  ;;  %455 = vmatprep.subr.bf16.mxu0 (!%p124_p2), %v497_v0  ;;  %461 = vmatprep.subr.bf16.mxu1 (!%p124_p2), %v497_v0  ;;  %p150_p3 = scmp.lt.s32.totalorder (!%p124_p2), %s436_s11, 7  ;;  %vm361_vm3 = vcmask (!%p124_p2), 58368  }
   0x7   : > { %457 = vmatprep.mubr.msk.bf16.mxu0 (!%p124_p2), %vm498_vm0, %v497_v0  ;;  %463 = vmatprep.mubr.msk.bf16.mxu1 (!%p124_p2), %vm498_vm0, %v497_v0 }
   0xd   : > { %s555_s11 = smov (!%p150_p3, %s436_s11), 7 }
   0xe   : > { %s438_s12 = sshll.u32 %s555_s11, 2  ;;  %s152_s18 = scalar_lea.vmem %s551_s0, %s555_s11 }
   0xf   : > { %s158_s15 = scalar_lea.vmem %s552_s1, %s438_s12  ;;  %v167_v7 = vld [vmem:[%s152_s18] sm:$0x1]  ;;  %v168_v8 = vld [vmem:[%s152_s18 + $0x1] sm:$0x1]  ;;  %v169_v11 = vld [vmem:[%s152_s18 + $0x2] sm:$0x1] }
  0x10   : > { %v171_v1 = vld [vmem:[%s158_s15] sm:$0xf]  ;;  %v172_v2 = vld [vmem:[%s158_s15 + $0x4] sm:$0xf]  ;;  %v173_v3 = vld [vmem:[%s158_s15 + $0x8] sm:$0xf] }
  0x11   : > { %v181_v4 = vsel %vm179_vm1, %v171_v1, 0  ;;  %v227_v5 = vsel %vm179_vm1, %v172_v2, 0  ;;  %v174_v6 = vld [vmem:[%s158_s15 + $0xc] sm:$0xf]  ;;  %v273_v9 = vsel %vm179_vm1, %v173_v3, 0  ;;  %s440_s19 = sshll.u32 %s555_s11, 1 }
  0x12   : > { %456 = vmatpush3.bf16.msra.mxu0 %v181_v4  ;;  %462 = vmatpush3.bf16.msra.mxu1 %v227_v5  ;;  %v319_v10 = vsel %vm179_vm1, %v174_v6, 0  ;;  %v170_v12 = vld [vmem:[%s152_s18 + $0x3] sm:$0x1]  ;;  %s164_s22 = scalar_lea.vmem %s553_s2, %s440_s19 }
  0x13   : > { %467 = vmatprep.subr.bf16.mxu0 %v497_v0  ;;  %473 = vmatprep.subr.bf16.mxu1 %v497_v0 }
  0x15   : > { %458 = vmatmul.mubr.msk.bf16.vlgmr.msra.gmra.mrb[0].mxu0 %vm175_vm2, %v167_v7  ;;  %464 = vmatmul.mubr.msk.bf16.vlgmr.msra.gmra.mrb[0].mxu1 %vm175_vm2, %v168_v8 }
  0x16   : > { %468 = vmatpush3.bf16.msra.mxu0 %v273_v9  ;;  %474 = vmatpush3.bf16.msra.mxu1 %v319_v10 }
  0x17   : > { %469 = vmatprep.mubr.msk.bf16.mxu0 %vm498_vm0, %v497_v0  ;;  %475 = vmatprep.mubr.msk.bf16.mxu1 %vm498_vm0, %v497_v0 }
  0x1d   : > { %470 = vmatmul.mubr.msk.bf16.vlgmr.msra.gmra.mrb[4].mxu0 %vm175_vm2, %v169_v11  ;;  %476 = vmatmul.mubr.msk.bf16.vlgmr.msra.gmra.mrb[4].mxu1 %vm175_vm2, %v170_v12 }
  0xe8   : > { %v217_v13 = vpop.f32.mrb[0].mxu0  ;;  %v263_v14 = vpop.f32.mrb[0].mxu1 }
  0xe9   : > { %362 = vst.msk [vmem:[%s164_s22] sm:$0x3] %vm361_vm3, %v217_v13  ;;  %v459_v15 = vpop.f32.mrb[1].mxu0  ;;  %v465_v16 = vpop.f32.mrb[1].mxu1  ;;  %363 = vst.msk [vmem:[%s164_s22 + $0x2] sm:$0x3] %vm361_vm3, %v263_v14 }
  0xea   : > { %v220_v17 = vpop.f32.mrb[2].mxu0  ;;  %v266_v18 = vpop.f32.mrb[2].mxu1 }
  0xeb   : > { %v460_v19 = vpop.f32.mrb[3].mxu0  ;;  %v466_v20 = vpop.f32.mrb[3].mxu1 }
  0xf0   : > { %v309_v21 = vpop.f32.mrb[4].mxu0  ;;  %v355_v22 = vpop.f32.mrb[4].mxu1 }
  0xf1   : > { %364 = vst.msk [vmem:[%s164_s22 + $0x4] sm:$0x3] %vm361_vm3, %v309_v21  ;;  %v471_v23 = vpop.f32.mrb[5].mxu0  ;;  %v477_v24 = vpop.f32.mrb[5].mxu1  ;;  %365 = vst.msk [vmem:[%s164_s22 + $0x6] sm:$0x3] %vm361_vm3, %v355_v22 }
  0xf2   : > { %v312_v25 = vpop.f32.mrb[6].mxu0  ;;  %v358_v26 = vpop.f32.mrb[6].mxu1 }
  0xf3   : > { %v472_v27 = vpop.f32.mrb[7].mxu0  ;;  %v478_v28 = vpop.f32.mrb[7].mxu1 }
  0xf4 PF: > { %s12_s9 = sadd.s32 1, %s495_s9  }
  0xf5   : > { %p9_p4 = scmp.ge.s32.totalorder %s12_s9, 4  }
  0xf7   :  { %11 = sbr.rel (!%p9_p4) target bundleno = 1 (0x1), region = 61 }

</bundles_post_ra>
